<compile_context>
chip_gen: v5e
topology: v5e:2x2
jax: 0.10.0
libtpu: 0.0.40
codegen_flags: <defaults>
</compile_context>

<pallas_src>
import functools

import jax
import jax.numpy as jnp
import numpy as np
from jax import lax
from jax.experimental import pallas as pl
from jax.experimental.pallas import tpu as pltpu


def _oks_kernel(sig4_ref, pk_ref, tk_ref, tbox_ref, out_ref, *, n_rows, k):
    """One tile of rows (predictions): rows on sublanes, keypoints on lanes."""
    t = pk_ref.shape[0]
    c3 = pk_ref.shape[1]            # 3*K  (interleaved x, y, score)
    c2 = tk_ref.shape[1]            # 2*K  (interleaved x, y)
    f32 = jnp.float32

    pk = pk_ref[...].astype(f32)            # (T, 3K)
    tk = tk_ref[...].astype(f32)            # (T, 2K)
    tb = tbox_ref[...].astype(f32)          # (T, 4)
    sig4 = sig4_ref[...]                    # (1, K)  = 4 * sigma^2

    # One-hot selector matrices built from iotas; selection matmuls on the MXU
    # de-interleave the channels exactly (products with 0.0 / 1.0 only).
    def select(cols_in, stride, offset):
        r = lax.broadcasted_iota(jnp.int32, (cols_in, k), 0)
        c = lax.broadcasted_iota(jnp.int32, (cols_in, k), 1)
        return (r == stride * c + offset).astype(f32)      # (cols_in, K)

    hi = lax.Precision.HIGHEST
    px = jnp.dot(pk, select(c3, 3, 0), precision=hi, preferred_element_type=f32)
    py = jnp.dot(pk, select(c3, 3, 1), precision=hi, preferred_element_type=f32)
    ps = jnp.dot(pk, select(c3, 3, 2), precision=hi, preferred_element_type=f32)
    tx = jnp.dot(tk, select(c2, 2, 0), precision=hi, preferred_element_type=f32)
    ty = jnp.dot(tk, select(c2, 2, 1), precision=hi, preferred_element_type=f32)

    # Visibility mask, same convention as the torch reference: target x != 0.
    mask = (tx != 0.0).astype(f32)                          # (T, K)

    # BCEWithLogitsLoss(reduction='none'), numerically stable; summed over K
    # (the 1/K and beta are applied in the epilogue).
    bce = jnp.maximum(ps, 0.0) - ps * mask + jnp.log1p(jnp.exp(-jnp.abs(ps)))
    bce_sum = jnp.sum(bce, axis=1, keepdims=True)           # (T, 1)

    # OKS term, summed over K (kpt_loss_factor * alpha / K applied in epilogue).
    d = (px - tx) ** 2 + (py - ty) ** 2                     # (T, K)
    s = tb[:, 2:3] * tb[:, 3:4]                             # (T, 1)   w * h
    oks = 1.0 - jnp.exp(-d / (s * sig4 + 1e-9))             # (T, K)
    lkpt_sum = jnp.sum(oks * mask, axis=1, keepdims=True)   # (T, 1)
    vis = jnp.sum(mask, axis=1, keepdims=True)              # (T, 1)

    # Ragged last block: rows >= n_rows were read from undefined memory.  Zero
    # them (their stores are masked anyway, but the visible count must be clean
    # and no NaN/inf should ever be produced for debug NaN-checkers).
    row = lax.broadcasted_iota(jnp.int32, (t, 1), 0) + pl.program_id(0) * t
    valid = row < n_rows
    lkpt_sum = jnp.where(valid, lkpt_sum, 0.0)
    bce_sum = jnp.where(valid, bce_sum, 0.0)
    vis = jnp.where(valid, vis, 0.0)

    # Pack the three per-row partials into lanes 0/1/2 of the (T, 3) output.
    lane = lax.broadcasted_iota(jnp.int32, (1, 3), 1)
    out_ref[...] = (jnp.where(lane == 0, lkpt_sum, 0.0)
                    + jnp.where(lane == 1, bce_sum, 0.0)
                    + jnp.where(lane == 2, vis, 0.0))


def oks_loss(pkpt, tkpt, tbox, sigmas, alpha=1.0, beta=2.0, tile_rows=2048):
    """pkpt: (N, 3K)  tkpt: (N, 2K)  tbox: (N, 4)  sigmas: (K,) -> (N,) loss."""
    N = pkpt.shape[0]
    K = pkpt.shape[1] // 3

    # Tile over predictions (rows); no jnp.pad — the last block may be ragged
    # and the kernel masks the tail.  tile is a multiple of 8 (sublane rule).
    tile = max(8, min((int(tile_rows) // 8) * 8, ((N + 7) // 8) * 8))
    grid = (pl.cdiv(N, tile),)

    sig4 = (4.0 * sigmas.astype(jnp.float32) ** 2).reshape(1, K)

    cost = pl.CostEstimate(
        flops=int(N * K * (26 * K + 24)),            # selection matmuls + elementwise
        transcendentals=int(3 * N * K),              # exp (oks) + exp,log1p (bce)
        bytes_accessed=int(N * 3 * K * pkpt.dtype.itemsize
                           + N * 2 * K * tkpt.dtype.itemsize
                           + N * 4 * tbox.dtype.itemsize
                           + N * 3 * 4))

    kernel = functools.partial(_oks_kernel, n_rows=N, k=K)
    out3 = pl.pallas_call(
        kernel,
        out_shape=jax.ShapeDtypeStruct((N, 3), jnp.float32),
        grid=grid,
        in_specs=[
            pl.BlockSpec((1, K), lambda i: (0, 0)),          # 4*sigma^2 (fetched once)
            pl.BlockSpec((tile, 3 * K), lambda i: (i, 0)),   # pkpt, natural layout
            pl.BlockSpec((tile, 2 * K), lambda i: (i, 0)),   # tkpt, natural layout
            pl.BlockSpec((tile, 4), lambda i: (i, 0)),       # tbox
        ],
        out_specs=pl.BlockSpec((tile, 3), lambda i: (i, 0)),
        compiler_params=pltpu.CompilerParams(
            dimension_semantics=("parallel",),
            vmem_limit_bytes=32 * 1024 * 1024),
        cost_estimate=cost,
    )(sig4, pkpt, tkpt, tbox)

    # Tiny XLA epilogue over (N, 3): global kpt_loss_factor and final combine.
    npos = jnp.sum(out3[:, 2])
    # NOTE: matches the torch reference exactly (inf -> NaN if nothing visible).
    factor = jnp.float32(N * K) / npos
    inv_k = jnp.float32(1.0 / K)
    return (alpha * factor * inv_k) * out3[:, 0] + (beta * inv_k) * out3[:, 1]


def _oks_loss_ref(pkpt, tkpt, tbox, sigmas, alpha=1.0, beta=2.0):
    """Pure-JAX reference mirroring the PyTorch forward exactly."""
    px, py, ps = pkpt[:, 0::3], pkpt[:, 1::3], pkpt[:, 2::3]
    tx, ty = tkpt[:, 0::2], tkpt[:, 1::2]
    mask = (tx != 0).astype(jnp.float32)
    bce = jnp.maximum(ps, 0.0) - ps * mask + jnp.log1p(jnp.exp(-jnp.abs(ps)))
    lkpt_conf = bce.mean(axis=1)
    d = (px - tx) ** 2 + (py - ty) ** 2
    s = jnp.prod(tbox[:, -2:], axis=1, keepdims=True)
    factor = mask.size / jnp.sum(mask)
    lkpt = factor * ((1.0 - jnp.exp(-d / (s * (4 * sigmas ** 2) + 1e-9))) * mask).mean(axis=1)
    return lkpt * alpha + lkpt_conf * beta


if __name__ == "__main__":
    # Small, COCO-like shapes: N=8 predictions, K=17 keypoints.
    N, K = 8, 17
    key = jax.random.PRNGKey(0)
    k1, k2, k3, k4 = jax.random.split(key, 4)

    pkpt = jax.random.normal(k1, (N, 3 * K), dtype=jnp.float32)
    tkpt = jax.random.uniform(k2, (N, 2 * K), dtype=jnp.float32,
                              minval=0.0, maxval=4.0)
    # zero-out ~30% of keypoints (both x and y) so the visibility mask is exercised
    vis = (jax.random.uniform(k3, (N, K)) > 0.3).astype(jnp.float32)
    vis2 = jnp.repeat(vis, 2, axis=1)
    tkpt = tkpt * vis2
    tbox = jax.random.uniform(k4, (N, 4), dtype=jnp.float32,
                              minval=0.5, maxval=2.0)

    # COCO-17 keypoint sigmas (supplied externally to the module; synthesized here)
    sigmas = jnp.array([.26, .25, .25, .35, .35, .79, .79, .72, .72, .62, .62,
                        1.07, 1.07, .87, .87, .89, .89], dtype=jnp.float32) / 10.0

    out = oks_loss(pkpt, tkpt, tbox, sigmas, alpha=1.0, beta=2.0)
    jax.block_until_ready(out)

    ref = _oks_loss_ref(pkpt, tkpt, tbox, sigmas, alpha=1.0, beta=2.0)
    np.testing.assert_allclose(np.asarray(out), np.asarray(ref),
                               rtol=1e-5, atol=1e-5)
    print("KERNEL_OK")
</pallas_src>

<mosaic_0001>
module attributes {stable_mosaic.version = 11 : i64} {
  func.func @_oks_kernel(%arg0: i32, %arg1: memref<1x17xf32, #tpu.memory_space<vmem>>, %arg2: memref<8x51xf32, #tpu.memory_space<vmem>>, %arg3: memref<8x34xf32, #tpu.memory_space<vmem>>, %arg4: memref<8x4xf32, #tpu.memory_space<vmem>>, %arg5: memref<8x3xf32, #tpu.memory_space<vmem>>) attributes {dimension_semantics = [#tpu.dimension_semantics<parallel>], iteration_bounds = array<i64: 1>, scalar_prefetch = 0 : i64, scratch_operands = 0 : i64, tpu.core_type = #tpu.core_type<tc>, window_params = [{pipeline_mode = #tpu.pipeline_mode<synchronous>, transform_indices = @transform_0, window_bounds = array<i64: 1, 17>}, {transform_indices = @transform_1, window_bounds = array<i64: 8, 51>}, {transform_indices = @transform_2, window_bounds = array<i64: 8, 34>}, {transform_indices = @transform_3, window_bounds = array<i64: 8, 4>}, {transform_indices = @transform_4, window_bounds = array<i64: 8, 3>}]} {
    %c0 = arith.constant 0 : index
    %c0_0 = arith.constant 0 : index
    %0 = vector.load %arg2[%c0, %c0_0] : memref<8x51xf32, #tpu.memory_space<vmem>>, vector<8x51xf32>
    %c0_1 = arith.constant 0 : index
    %c0_2 = arith.constant 0 : index
    %1 = vector.load %arg3[%c0_1, %c0_2] : memref<8x34xf32, #tpu.memory_space<vmem>>, vector<8x34xf32>
    %c0_3 = arith.constant 0 : index
    %c0_4 = arith.constant 0 : index
    %2 = vector.load %arg4[%c0_3, %c0_4] : memref<8x4xf32, #tpu.memory_space<vmem>>, vector<8x4xf32>
    %c0_5 = arith.constant 0 : index
    %c0_6 = arith.constant 0 : index
    %3 = vector.load %arg1[%c0_5, %c0_6] : memref<1x17xf32, #tpu.memory_space<vmem>>, vector<1x17xf32>
    %4 = tpu.iota {dimensions = array<i32: 0>} : vector<51x17xi32>
    %5 = tpu.iota {dimensions = array<i32: 1>} : vector<51x17xi32>
    %c3_i32 = arith.constant 3 : i32
    %6 = vector.broadcast %c3_i32 : i32 to vector<51x17xi32>
    %7 = arith.muli %6, %5 : vector<51x17xi32>
    %c0_i32 = arith.constant 0 : i32
    %8 = vector.broadcast %c0_i32 : i32 to vector<51x17xi32>
    %9 = arith.addi %7, %8 : vector<51x17xi32>
    %10 = arith.cmpi eq, %4, %9 : vector<51x17xi32>
    %11 = arith.extui %10 : vector<51x17xi1> to vector<51x17xi32>
    %12 = arith.sitofp %11 : vector<51x17xi32> to vector<51x17xf32>
    %cst = arith.constant dense<0.000000e+00> : vector<8x17xf32>
    %13 = tpu.matmul %0, %12, %cst {dimension_numbers = #tpu.dot_dimension_numbers<[1], [0], [0], [1], [0, 0, 1, 1], [], []>, precision = #tpu.contract_precision<fp32>} : vector<8x51xf32>, vector<51x17xf32>, vector<8x17xf32> -> vector<8x17xf32>
    %14 = tpu.iota {dimensions = array<i32: 0>} : vector<51x17xi32>
    %15 = tpu.iota {dimensions = array<i32: 1>} : vector<51x17xi32>
    %c3_i32_7 = arith.constant 3 : i32
    %16 = vector.broadcast %c3_i32_7 : i32 to vector<51x17xi32>
    %17 = arith.muli %16, %15 : vector<51x17xi32>
    %c1_i32 = arith.constant 1 : i32
    %18 = vector.broadcast %c1_i32 : i32 to vector<51x17xi32>
    %19 = arith.addi %17, %18 : vector<51x17xi32>
    %20 = arith.cmpi eq, %14, %19 : vector<51x17xi32>
    %21 = arith.extui %20 : vector<51x17xi1> to vector<51x17xi32>
    %22 = arith.sitofp %21 : vector<51x17xi32> to vector<51x17xf32>
    %cst_8 = arith.constant dense<0.000000e+00> : vector<8x17xf32>
    %23 = tpu.matmul %0, %22, %cst_8 {dimension_numbers = #tpu.dot_dimension_numbers<[1], [0], [0], [1], [0, 0, 1, 1], [], []>, precision = #tpu.contract_precision<fp32>} : vector<8x51xf32>, vector<51x17xf32>, vector<8x17xf32> -> vector<8x17xf32>
    %24 = tpu.iota {dimensions = array<i32: 0>} : vector<51x17xi32>
    %25 = tpu.iota {dimensions = array<i32: 1>} : vector<51x17xi32>
    %c3_i32_9 = arith.constant 3 : i32
    %26 = vector.broadcast %c3_i32_9 : i32 to vector<51x17xi32>
    %27 = arith.muli %26, %25 : vector<51x17xi32>
    %c2_i32 = arith.constant 2 : i32
    %28 = vector.broadcast %c2_i32 : i32 to vector<51x17xi32>
    %29 = arith.addi %27, %28 : vector<51x17xi32>
    %30 = arith.cmpi eq, %24, %29 : vector<51x17xi32>
    %31 = arith.extui %30 : vector<51x17xi1> to vector<51x17xi32>
    %32 = arith.sitofp %31 : vector<51x17xi32> to vector<51x17xf32>
    %cst_10 = arith.constant dense<0.000000e+00> : vector<8x17xf32>
    %33 = tpu.matmul %0, %32, %cst_10 {dimension_numbers = #tpu.dot_dimension_numbers<[1], [0], [0], [1], [0, 0, 1, 1], [], []>, precision = #tpu.contract_precision<fp32>} : vector<8x51xf32>, vector<51x17xf32>, vector<8x17xf32> -> vector<8x17xf32>
    %34 = tpu.iota {dimensions = array<i32: 0>} : vector<34x17xi32>
    %35 = tpu.iota {dimensions = array<i32: 1>} : vector<34x17xi32>
    %c2_i32_11 = arith.constant 2 : i32
    %36 = vector.broadcast %c2_i32_11 : i32 to vector<34x17xi32>
    %37 = arith.muli %36, %35 : vector<34x17xi32>
    %c0_i32_12 = arith.constant 0 : i32
    %38 = vector.broadcast %c0_i32_12 : i32 to vector<34x17xi32>
    %39 = arith.addi %37, %38 : vector<34x17xi32>
    %40 = arith.cmpi eq, %34, %39 : vector<34x17xi32>
    %41 = arith.extui %40 : vector<34x17xi1> to vector<34x17xi32>
    %42 = arith.sitofp %41 : vector<34x17xi32> to vector<34x17xf32>
    %cst_13 = arith.constant dense<0.000000e+00> : vector<8x17xf32>
    %43 = tpu.matmul %1, %42, %cst_13 {dimension_numbers = #tpu.dot_dimension_numbers<[1], [0], [0], [1], [0, 0, 1, 1], [], []>, precision = #tpu.contract_precision<fp32>} : vector<8x34xf32>, vector<34x17xf32>, vector<8x17xf32> -> vector<8x17xf32>
    %44 = tpu.iota {dimensions = array<i32: 0>} : vector<34x17xi32>
    %45 = tpu.iota {dimensions = array<i32: 1>} : vector<34x17xi32>
    %c2_i32_14 = arith.constant 2 : i32
    %46 = vector.broadcast %c2_i32_14 : i32 to vector<34x17xi32>
    %47 = arith.muli %46, %45 : vector<34x17xi32>
    %c1_i32_15 = arith.constant 1 : i32
    %48 = vector.broadcast %c1_i32_15 : i32 to vector<34x17xi32>
    %49 = arith.addi %47, %48 : vector<34x17xi32>
    %50 = arith.cmpi eq, %44, %49 : vector<34x17xi32>
    %51 = arith.extui %50 : vector<34x17xi1> to vector<34x17xi32>
    %52 = arith.sitofp %51 : vector<34x17xi32> to vector<34x17xf32>
    %cst_16 = arith.constant dense<0.000000e+00> : vector<8x17xf32>
    %53 = tpu.matmul %1, %52, %cst_16 {dimension_numbers = #tpu.dot_dimension_numbers<[1], [0], [0], [1], [0, 0, 1, 1], [], []>, precision = #tpu.contract_precision<fp32>} : vector<8x34xf32>, vector<34x17xf32>, vector<8x17xf32> -> vector<8x17xf32>
    %cst_17 = arith.constant 0.000000e+00 : f32
    %54 = vector.broadcast %cst_17 : f32 to vector<8x17xf32>
    %55 = arith.cmpf one, %43, %54 : vector<8x17xf32>
    %56 = arith.extui %55 : vector<8x17xi1> to vector<8x17xi32>
    %57 = arith.sitofp %56 : vector<8x17xi32> to vector<8x17xf32>
    %cst_18 = arith.constant 0.000000e+00 : f32
    %58 = vector.broadcast %cst_18 : f32 to vector<8x17xf32>
    %59 = arith.maximumf %33, %58 : vector<8x17xf32>
    %60 = arith.mulf %33, %57 : vector<8x17xf32>
    %61 = arith.subf %59, %60 : vector<8x17xf32>
    %62 = math.absf %33 : vector<8x17xf32>
    %cst_19 = arith.constant 0.000000e+00 : f32
    %63 = vector.broadcast %cst_19 : f32 to vector<8x17xf32>
    %64 = arith.subf %63, %62 : vector<8x17xf32>
    %65 = math.exp %64 : vector<8x17xf32>
    %66 = math.log1p %65 : vector<8x17xf32>
    %67 = arith.addf %61, %66 : vector<8x17xf32>
    %cst_20 = arith.constant dense<0.000000e+00> : vector<8xf32>
    %68 = vector.multi_reduction <add>, %67, %cst_20 [1] : vector<8x17xf32> to vector<8xf32>
    %69 = vector.shape_cast %68 : vector<8xf32> to vector<8x1xf32>
    %70 = arith.subf %13, %43 : vector<8x17xf32>
    %71 = arith.mulf %70, %70 : vector<8x17xf32>
    %72 = arith.subf %23, %53 : vector<8x17xf32>
    %73 = arith.mulf %72, %72 : vector<8x17xf32>
    %74 = arith.addf %71, %73 : vector<8x17xf32>
    %75 = vector.extract_strided_slice %2 {offsets = [0, 2], sizes = [8, 1], strides = [1, 1]} : vector<8x4xf32> to vector<8x1xf32>
    %76 = vector.extract_strided_slice %2 {offsets = [0, 3], sizes = [8, 1], strides = [1, 1]} : vector<8x4xf32> to vector<8x1xf32>
    %77 = arith.mulf %75, %76 : vector<8x1xf32>
    %cst_21 = arith.constant 0.000000e+00 : f32
    %78 = vector.broadcast %cst_21 : f32 to vector<8x17xf32>
    %79 = arith.subf %78, %74 : vector<8x17xf32>
    %80 = vector.broadcast %77 : vector<8x1xf32> to vector<8x17xf32>
    %81 = vector.broadcast %3 : vector<1x17xf32> to vector<8x17xf32>
    %82 = arith.mulf %80, %81 : vector<8x17xf32>
    %cst_22 = arith.constant 9.99999971E-10 : f32
    %83 = vector.broadcast %cst_22 : f32 to vector<8x17xf32>
    %84 = arith.addf %82, %83 : vector<8x17xf32>
    %85 = arith.divf %79, %84 : vector<8x17xf32>
    %86 = math.exp %85 : vector<8x17xf32>
    %cst_23 = arith.constant 1.000000e+00 : f32
    %87 = vector.broadcast %cst_23 : f32 to vector<8x17xf32>
    %88 = arith.subf %87, %86 : vector<8x17xf32>
    %89 = arith.mulf %88, %57 : vector<8x17xf32>
    %cst_24 = arith.constant dense<0.000000e+00> : vector<8xf32>
    %90 = vector.multi_reduction <add>, %89, %cst_24 [1] : vector<8x17xf32> to vector<8xf32>
    %91 = vector.shape_cast %90 : vector<8xf32> to vector<8x1xf32>
    %cst_25 = arith.constant dense<0.000000e+00> : vector<8xf32>
    %92 = vector.multi_reduction <add>, %57, %cst_25 [1] : vector<8x17xf32> to vector<8xf32>
    %93 = vector.shape_cast %92 : vector<8xf32> to vector<8x1xf32>
    %94 = tpu.iota {dimensions = array<i32: 0>} : vector<8x1xi32>
    %c8_i32 = arith.constant 8 : i32
    %95 = arith.muli %arg0, %c8_i32 : i32
    %96 = vector.broadcast %95 : i32 to vector<8x1xi32>
    %97 = arith.addi %94, %96 : vector<8x1xi32>
    %c8_i32_26 = arith.constant 8 : i32
    %98 = vector.broadcast %c8_i32_26 : i32 to vector<8x1xi32>
    %99 = arith.cmpi slt, %97, %98 : vector<8x1xi32>
    %cst_27 = arith.constant 0.000000e+00 : f32
    %100 = vector.broadcast %cst_27 : f32 to vector<8x1xf32>
    %101 = arith.select %99, %91, %100 : vector<8x1xi1>, vector<8x1xf32>
    %cst_28 = arith.constant 0.000000e+00 : f32
    %102 = vector.broadcast %cst_28 : f32 to vector<8x1xf32>
    %103 = arith.select %99, %69, %102 : vector<8x1xi1>, vector<8x1xf32>
    %cst_29 = arith.constant 0.000000e+00 : f32
    %104 = vector.broadcast %cst_29 : f32 to vector<8x1xf32>
    %105 = arith.select %99, %93, %104 : vector<8x1xi1>, vector<8x1xf32>
    %106 = tpu.iota {dimensions = array<i32: 1>} : vector<1x3xi32>
    %c0_i32_30 = arith.constant 0 : i32
    %107 = vector.broadcast %c0_i32_30 : i32 to vector<1x3xi32>
    %108 = arith.cmpi eq, %106, %107 : vector<1x3xi32>
    %cst_31 = arith.constant 0.000000e+00 : f32
    %109 = vector.shape_cast %108 : vector<1x3xi1> to vector<1x3xi1>
    %110 = vector.broadcast %109 : vector<1x3xi1> to vector<8x3xi1>
    %111 = vector.shape_cast %101 : vector<8x1xf32> to vector<8x1xf32>
    %112 = vector.broadcast %111 : vector<8x1xf32> to vector<8x3xf32>
    %113 = vector.broadcast %cst_31 : f32 to vector<8x3xf32>
    %114 = arith.select %110, %112, %113 : vector<8x3xi1>, vector<8x3xf32>
    %c1_i32_32 = arith.constant 1 : i32
    %115 = vector.broadcast %c1_i32_32 : i32 to vector<1x3xi32>
    %116 = arith.cmpi eq, %106, %115 : vector<1x3xi32>
    %cst_33 = arith.constant 0.000000e+00 : f32
    %117 = vector.shape_cast %116 : vector<1x3xi1> to vector<1x3xi1>
    %118 = vector.broadcast %117 : vector<1x3xi1> to vector<8x3xi1>
    %119 = vector.shape_cast %103 : vector<8x1xf32> to vector<8x1xf32>
    %120 = vector.broadcast %119 : vector<8x1xf32> to vector<8x3xf32>
    %121 = vector.broadcast %cst_33 : f32 to vector<8x3xf32>
    %122 = arith.select %118, %120, %121 : vector<8x3xi1>, vector<8x3xf32>
    %123 = arith.addf %114, %122 : vector<8x3xf32>
    %c2_i32_34 = arith.constant 2 : i32
    %124 = vector.broadcast %c2_i32_34 : i32 to vector<1x3xi32>
    %125 = arith.cmpi eq, %106, %124 : vector<1x3xi32>
    %cst_35 = arith.constant 0.000000e+00 : f32
    %126 = vector.shape_cast %125 : vector<1x3xi1> to vector<1x3xi1>
    %127 = vector.broadcast %126 : vector<1x3xi1> to vector<8x3xi1>
    %128 = vector.shape_cast %105 : vector<8x1xf32> to vector<8x1xf32>
    %129 = vector.broadcast %128 : vector<8x1xf32> to vector<8x3xf32>
    %130 = vector.broadcast %cst_35 : f32 to vector<8x3xf32>
    %131 = arith.select %127, %129, %130 : vector<8x3xi1>, vector<8x3xf32>
    %132 = arith.addf %123, %131 : vector<8x3xf32>
    %c0_36 = arith.constant 0 : index
    %c0_37 = arith.constant 0 : index
    %133 = vector.load %arg5[%c0_36, %c0_37] : memref<8x3xf32, #tpu.memory_space<vmem>>, vector<8x3xf32>
    tpu.vector_store %arg5[%c0_36, %c0_37], %132 {strides = array<i32>} : memref<8x3xf32, #tpu.memory_space<vmem>>, vector<8x3xf32>,
    return
  }
  func.func @transform_0(%arg0: i32) -> (i32, i32) {
    %c0_i32 = arith.constant 0 : i32
    %c0_i32_0 = arith.constant 0 : i32
    %c0_i32_1 = arith.constant 0 : i32
    return %c0_i32, %c0_i32_0 : i32, i32
  }
  func.func @transform_1(%arg0: i32) -> (i32, i32) {
    %c0_i32 = arith.constant 0 : i32
    %c0_i32_0 = arith.constant 0 : i32
    return %arg0, %c0_i32 : i32, i32
  }
  func.func @transform_2(%arg0: i32) -> (i32, i32) {
    %c0_i32 = arith.constant 0 : i32
    %c0_i32_0 = arith.constant 0 : i32
    return %arg0, %c0_i32 : i32, i32
  }
  func.func @transform_3(%arg0: i32) -> (i32, i32) {
    %c0_i32 = arith.constant 0 : i32
    %c0_i32_0 = arith.constant 0 : i32
    return %arg0, %c0_i32 : i32, i32
  }
  func.func @transform_4(%arg0: i32) -> (i32, i32) {
    %c0_i32 = arith.constant 0 : i32
    %c0_i32_0 = arith.constant 0 : i32
    return %arg0, %c0_i32 : i32, i32
  }
}

</mosaic_0001>

<bundles_post_ra>
// kernel: tpu_custom_call.1
= control target key start
LH: loop header
LB: loop body
LE: loop exit
PB: predicated region body
PF: predicated region fallthrough
CT: control target
= control target key end

     0   :  { %9 = vsyncpa [#allocation3], 0  ;;  %s1500_s18 = smov [#allocation2]   ;;  %s2453_s0 = inlined_call_operand.vmem [shape: f32[1,17], index: 0, kind: input, shape index: {}]   ;;  %s2454_s1 = inlined_call_operand.vmem [shape: f32[8,51], index: 1, kind: input, shape index: {}]   ;;  %s2455_s2 = inlined_call_operand.hbm [shape: f32[8,34], index: 2, kind: input, shape index: {}]   ;;  %s2456_s3 = inlined_call_operand.vmem [shape: f32[8,4], index: 3, kind: input, shape index: {}]   ;;  %s2457_s4 = inlined_call_operand.vmem [shape: f32[8,3], index: 4, kind: output, shape index: {}]  }
   0x1   :  { %s19_s17 = sshll.u32 %s2455_s2, 4  ;;  %s21_s19 = sshll.u32 %s1500_s18, 4  ;;  %s20_s17 = int_to_ptr.hbm [resolvable:$true] %s19_s17  ;;  %s22_s19 = int_to_ptr.vmem [resolvable:$true] %s21_s19 }
   0x2   :  { %24 = dma.hbm_to_vmem [thread:$0]  %s20_s17, 128, %s22_s19, [#allocation3]  }
   0x3   :  { %1498 = dma.done.wait [#allocation3], 128  }
   0x4   :  { %1499 = vsyncadd [#allocation3], 4294967168  ;;  %v35_v0 = vlaneseq  ;;  %vm71_vm0 = vcmask 1042432   ;;  %v1569_v10 = vld [vmem:[%s2456_s3] sm:$0xff]  ;;  %v1501_v11 = vmov 0.0   ;;  %s1502_s21 = smov 127  }
   0x5   :  { %1266 = vrot.lane.b32.xlu0 %v1569_v10, %s1502_s21  ;;  %v1503_v21 = vmov 1.0   ;;  %vm67_vm8 = vcmask 416768  }
   0x6   :  { %v1533_v1 = vshrl.u32 %v35_v0, 7  ;;  %v1535_v2 = vand.u32 127, %v35_v0  ;;  %v31_v0 = vld [vmem:[%s2454_s1] sm:$0xff] }
   0x8   :  { %v1538_v3 = vadd.s32 48, %v1533_v1  ;;  %v1541_v4 = vmul.u32 3, %v1535_v2  ;;  %v1544_v5 = vadd.s32 40, %v1533_v1  ;;  %v1547_v6 = vadd.s32 32, %v1533_v1 }
   0x9   :  { %v1550_v7 = vadd.s32 24, %v1533_v1  ;;  %v1553_v8 = vadd.s32 16, %v1533_v1  ;;  %v1556_v9 = vadd.s32 8, %v1533_v1 }
   0xa   :  { %vm52_vm1 = vcmp.eq.s32.totalorder %v1538_v3, %v1541_v4  ;;  %vm51_vm2 = vcmp.eq.s32.totalorder %v1544_v5, %v1541_v4  ;;  %vm50_vm3 = vcmp.eq.s32.totalorder %v1547_v6, %v1541_v4  ;;  %vm46_vm4 = vcmp.eq.s32.totalorder %v1533_v1, %v1541_v4 }
   0xb   :  { %v1572_v12 = vsel %vm52_vm1, 1.0, %v1501_v11  ;;  %v1339_v13 = vsel %vm51_vm2, 1.0, %v1501_v11  ;;  %v1338_v14 = vsel %vm50_vm3, 1.0, %v1501_v11  ;;  %vm49_vm5 = vcmp.eq.s32.totalorder %v1550_v7, %v1541_v4 }
   0xc   :  { %v73_v15 = vsel %vm71_vm0, %v1572_v12, 0  ;;  %v1587_v16 = vsub.f32 %v1339_v13, %v1339_v13  ;;  %1348 = vmatpush.msk.msra.mxu3 %vm71_vm0, %v1572_v12  ;;  %v1591_v17 = vsub.f32 %v1338_v14, %v1338_v14  ;;  %v1337_v18 = vsel %vm49_vm5, 1.0, %v1501_v11  ;;  %1341 = vmatpush.msk.msra.mxu0 %vm71_vm0, %v1572_v12 }
   0xd   :  { %v1597_v19 = vsub.f32 %v73_v15, %v73_v15  ;;  %v1601_v20 = vsub.f32 %v1337_v18, %v1337_v18  ;;  %vm48_vm6 = vcmp.eq.s32.totalorder %v1553_v8, %v1541_v4  ;;  %vm47_vm7 = vcmp.eq.s32.totalorder %v1556_v9, %v1541_v4 }
   0xe   :  { %1349 = vmatpush.msk.msra.mxu3 %vm51_vm2, %v1503_v21  ;;  %v124_v22 = vand.u32 4294901760, %v1587_v16  ;;  %v1336_v23 = vsel %vm48_vm6, 1.0, %v1501_v11  ;;  %v130_v24 = vand.u32 4294901760, %v1591_v17  ;;  %v1335_v25 = vsel %vm47_vm7, 1.0, %v1501_v11  ;;  %1342 = vmatpush.msk.msra.mxu0 %vm51_vm2, %v1503_v21 }
   0xf   :  { %174 = vmatpush.msra.mxu2 %v1597_v19  ;;  %v118_v26 = vand.u32 4294901760, %v1597_v19  ;;  %v1627_v27 = vsub.f32 %v1336_v23, %v1336_v23  ;;  %v1629_v28 = vsub.f32 %v1335_v25, %v1335_v25  ;;  %v136_v29 = vand.u32 4294901760, %v1601_v20 }
  0x10   :  { %1350 = vmatpush.msk.msra.mxu3 %vm50_vm3, %v1503_v21  ;;  %v125_v30 = vsub.f32 %v1587_v16, %v124_v22  ;;  %v131_v31 = vsub.f32 %v1591_v17, %v130_v24  ;;  %v1334_v32 = vsel %vm46_vm4, 1.0, %v1501_v11  ;;  %v1647_v33 = vadd.s32 1, %v1541_v4  ;;  %1343 = vmatpush.msk.msra.mxu0 %vm50_vm3, %v1503_v21 }
  0x11   :  { %177 = vmatpush.msra.mxu2 %v1587_v16  ;;  %v119_v34 = vsub.f32 %v1597_v19, %v118_v26  ;;  %v137_v35 = vsub.f32 %v1601_v20, %v136_v29  ;;  %v1660_v36 = vsub.f32 %v1334_v32, %v1334_v32  ;;  %v142_v37 = vand.u32 4294901760, %v1627_v27 }
  0x12   :  { %v126_v38 = vand.u32 4294901760, %v125_v30  ;;  %1351 = vmatpush.msk.msra.mxu3 %vm49_vm5, %v1503_v21  ;;  %v132_v39 = vand.u32 4294901760, %v131_v31  ;;  %vm306_vm9 = vcmp.eq.s32.totalorder %v1538_v3, %v1647_v33  ;;  %vm305_vm10 = vcmp.eq.s32.totalorder %v1544_v5, %v1647_v33  ;;  %1344 = vmatpush.msk.msra.mxu0 %vm49_vm5, %v1503_v21 }
  0x13   :  { %180 = vmatpush.msra.mxu2 %v1591_v17  ;;  %v120_v40 = vand.u32 4294901760, %v119_v34  ;;  %v138_v41 = vand.u32 4294901760, %v137_v35  ;;  %v1677_v42 = vsel %vm306_vm9, 1.0, %v1501_v11  ;;  %v143_v43 = vsub.f32 %v1627_v27, %v142_v37 }
  0x14   :  { %1352 = vmatpush.msk.msra.mxu3 %vm48_vm6, %v1503_v21  ;;  %v322_v44 = vsel %vm71_vm0, %v1677_v42, 0  ;;  %v148_v45 = vand.u32 4294901760, %v1629_v28  ;;  %vm304_vm11 = vcmp.eq.s32.totalorder %v1547_v6, %v1647_v33  ;;  %v1367_v46 = vsel %vm305_vm10, 1.0, %v1501_v11  ;;  %1345 = vmatpush.msk.msra.mxu0 %vm48_vm6, %v1503_v21 }
  0x15   :  { %121 = vmatpush.msra.mxu1 %v120_v40  ;;  %183 = vmatpush.msra.mxu2 %v1601_v20  ;;  %v144_v47 = vand.u32 4294901760, %v143_v43  ;;  %v1696_v48 = vsub.f32 %v322_v44, %v322_v44  ;;  %v1698_v49 = vsub.f32 %v1367_v46, %v1367_v46  ;;  %v154_v50 = vand.u32 4294901760, %v1660_v36 }
  0x16   :  { %1353 = vmatpush.msk.msra.mxu3 %vm47_vm7, %v1503_v21  ;;  %v149_v51 = vsub.f32 %v1629_v28, %v148_v45  ;;  %vm303_vm12 = vcmp.eq.s32.totalorder %v1550_v7, %v1647_v33  ;;  %v1366_v52 = vsel %vm304_vm11, 1.0, %v1501_v11  ;;  %vm302_vm13 = vcmp.eq.s32.totalorder %v1553_v8, %v1647_v33  ;;  %1346 = vmatpush.msk.msra.mxu0 %vm47_vm7, %v1503_v21 }
  0x17   :  { %127 = vmatpush.msra.mxu1 %v126_v38  ;;  %186 = vmatpush.msra.mxu2 %v1627_v27  ;;  %v367_v53 = vand.u32 4294901760, %v1696_v48  ;;  %v373_v54 = vand.u32 4294901760, %v1698_v49  ;;  %v155_v55 = vsub.f32 %v1660_v36, %v154_v50  ;;  %v1726_v56 = vsub.f32 %v1366_v52, %v1366_v52 }
  0x18   :  { %1354 = vmatpush.msk.msra.mxu3 %vm46_vm4, %v1503_v21  ;;  %v150_v57 = vand.u32 4294901760, %v149_v51  ;;  %v1365_v58 = vsel %vm303_vm12, 1.0, %v1501_v11  ;;  %vm301_vm14 = vcmp.eq.s32.totalorder %v1556_v9, %v1647_v33  ;;  %v1364_v59 = vsel %vm302_vm13, 1.0, %v1501_v11  ;;  %1347 = vmatpush.msk.msra.mxu0 %vm46_vm4, %v1503_v21 }
  0x19   :  { %133 = vmatpush.msra.mxu1 %v132_v39  ;;  %189 = vmatpush.msra.mxu2 %v1629_v28  ;;  %v368_v60 = vsub.f32 %v1696_v48, %v367_v53  ;;  %v374_v61 = vsub.f32 %v1698_v49, %v373_v54  ;;  %v156_v62 = vand.u32 4294901760, %v155_v55  ;;  %v379_v63 = vand.u32 4294901760, %v1726_v56 }
  0x1a   :  { %v1761_v13 = vsub.f32 %v1365_v58, %v1365_v58  ;;  %v1763_v14 = vsub.f32 %v1364_v59, %v1364_v59  ;;  %vm300_vm15 = vcmp.eq.s32.totalorder %v1533_v1, %v1647_v33  ;;  %v1363_v15 = vsel %vm301_vm14, 1.0, %v1501_v11  ;;  %241 = vmatpush.msrb.mxu0 %v118_v26 }
  0x1b   :  { %139 = vmatpush.msra.mxu1 %v138_v41  ;;  %192 = vmatpush.msra.mxu2 %v1660_v36  ;;  %v369_v18 = vand.u32 4294901760, %v368_v60  ;;  %v375_v23 = vand.u32 4294901760, %v374_v61  ;;  %v380_v25 = vsub.f32 %v1726_v56, %v379_v63  ;;  %v1775_v30 = vsub.f32 %v1363_v15, %v1363_v15 }
  0x1c   :  { %v385_v31 = vand.u32 4294901760, %v1761_v13  ;;  %v391_v32 = vand.u32 4294901760, %v1763_v14  ;;  %v69_v34 = vsel %vm67_vm8, %v31_v0, 0  ;;  %v1362_v35 = vsel %vm300_vm15, 1.0, %v1501_v11  ;;  %245 = vmatpush.msrb.mxu0 %v124_v22 }
  0x1d   :  { %1369 = vmatpush.msk.msrb.mxu2 %vm71_vm0, %v1677_v42  ;;  %145 = vmatpush.msra.mxu1 %v144_v47  ;;  %v381_v38 = vand.u32 4294901760, %v380_v25  ;;  %v397_v39 = vand.u32 4294901760, %v1775_v30  ;;  %v1789_v40 = vand.u32 4294901760, %v69_v34  ;;  %v1791_v19 = vsub.f32 %v1362_v35, %v1362_v35 }
  0x1e   :  { %370 = vmatpush.msrb.mxu3 %v369_v18  ;;  %v386_v26 = vsub.f32 %v1761_v13, %v385_v31  ;;  %v392_v41 = vsub.f32 %v1763_v14, %v391_v32  ;;  %249 = vmatpush.msrb.mxu0 %v130_v24  ;;  %v1833_v51 = vadd.s32 2, %v1541_v4 }
  0x1f   :  { %1370 = vmatpush.msk.msrb.mxu2 %vm305_vm10, %v1503_v21  ;;  %151 = vmatpush.msra.mxu1 %v150_v57  ;;  %v398_v43 = vsub.f32 %v1775_v30, %v397_v39  ;;  %v1809_v44 = vsub.f32 %v69_v34, %v1789_v40  ;;  %v403_v16 = vand.u32 4294901760, %v1791_v19 }
  0x20   :  { %376 = vmatpush.msrb.mxu3 %v375_v23  ;;  %v387_v22 = vand.u32 4294901760, %v386_v26  ;;  %v393_v46 = vand.u32 4294901760, %v392_v41  ;;  %253 = vmatpush.msrb.mxu0 %v136_v29  ;;  %vm555_vm1 = vcmp.eq.s32.totalorder %v1538_v3, %v1833_v51  ;;  %v1909_v29 = vmul.u32 2, %v1535_v2 }
  0x21   :  { %1371 = vmatpush.msk.msrb.mxu2 %vm304_vm11, %v1503_v21  ;;  %157 = vmatpush.msra.mxu1 %v156_v62  ;;  %v1819_v47 = vand.u32 4294901760, %v1809_v44  ;;  %v404_v17 = vsub.f32 %v1791_v19, %v403_v16  ;;  %v399_v24 = vand.u32 4294901760, %v398_v43  ;;  %v1877_v3 = vsel %vm555_vm1, 1.0, %v1501_v11 }
  0x22   :  { %382 = vmatpush.msrb.mxu3 %v381_v38  ;;  %257 = vmatpush.msrb.mxu0 %v142_v37  ;;  %v571_v28 = vsel %vm71_vm0, %v1877_v3, 0  ;;  %vm550_vm8 = vcmp.eq.s32.totalorder %v1556_v9, %v1833_v51  ;;  %vm801_vm9 = vcmp.eq.s32.totalorder %v1550_v7, %v1909_v29 }
  0x23   :  { %1355 = vmatpush.msk.msrb.mxu1 %vm71_vm0, %v1572_v12  ;;  %1372 = vmatpush.msk.msrb.mxu2 %vm303_vm12, %v1503_v21  ;;  %v101_v12 = vsub.f32 %v1809_v44, %v1819_v47  ;;  %v405_v20 = vand.u32 4294901760, %v404_v17  ;;  %v1913_v36 = vsub.f32 %v571_v28, %v571_v28  ;;  %v1391_v60 = vsel %vm550_vm8, 1.0, %v1501_v11 }
  0x24   :  { %388 = vmatpush.msrb.mxu3 %v387_v22  ;;  %195 = vmatmul.f32.vlgmr.msra.gmra.mxu2 %v1809_v44  ;;  %v2046_v15 = vsub.f32 %v1391_v60, %v1391_v60 }
  0x25   :  { %1356 = vmatpush.msk.msrb.mxu1 %vm51_vm2, %v1503_v21  ;;  %1373 = vmatpush.msk.msrb.mxu2 %vm302_vm13, %v1503_v21  ;;  %v1870_v27 = vand.u32 4294901760, %v101_v12  ;;  %vm554_vm2 = vcmp.eq.s32.totalorder %v1544_v5, %v1833_v51 }
  0x26   :  { %394 = vmatpush.msrb.mxu3 %v393_v46  ;;  %261 = vmatpush.msrb.mxu0 %v148_v45  ;;  %v1395_v37 = vsel %vm554_vm2, 1.0, %v1501_v11  ;;  %v616_v45 = vand.u32 4294901760, %v1913_v36 }
  0x27   :  { %1357 = vmatpush.msk.msrb.mxu1 %vm50_vm3, %v1503_v21  ;;  %1374 = vmatpush.msk.msrb.mxu2 %vm301_vm14, %v1503_v21  ;;  %vm553_vm3 = vcmp.eq.s32.totalorder %v1547_v6, %v1833_v51 }
  0x28   :  { %400 = vmatpush.msrb.mxu3 %v399_v24  ;;  %265 = vmatpush.msrb.mxu0 %v154_v50  ;;  %v1394_v4 = vsel %vm553_vm3, 1.0, %v1501_v11  ;;  %v617_v55 = vsub.f32 %v1913_v36, %v616_v45 }
  0x29   :  { %1358 = vmatpush.msk.msrb.mxu1 %vm49_vm5, %v1503_v21  ;;  %1375 = vmatpush.msk.msrb.mxu2 %vm300_vm15, %v1503_v21  ;;  %vm802_vm5 = vcmp.eq.s32.totalorder %v1547_v6, %v1909_v29 }
  0x2a   :  { %406 = vmatpush.msrb.mxu3 %v405_v20  ;;  %103 = vmatmul.f32.vlgmr.msra.gmra.mxu0 %v1870_v27  ;;  %v1970_v50 = vsel %vm802_vm5, 1.0, %v1501_v11  ;;  %v618_v62 = vand.u32 4294901760, %v617_v55 }
  0x2b   :  { %490 = vmatpush.msra.mxu2 %v367_v53  ;;  %1359 = vmatpush.msk.msrb.mxu1 %vm48_vm6, %v1503_v21  ;;  %vm551_vm6 = vcmp.eq.s32.totalorder %v1553_v8, %v1833_v51 }
  0x2c   :  { %225 = vmatmul.f32.vlgmr.msra.gmra.mxu3 %v1819_v47  ;;  %423 = vmatpush.msra.mxu0 %v1696_v48 }
  0x2d   :  { %494 = vmatpush.msra.mxu2 %v373_v54  ;;  %1383 = vmatpush.msk.msra.mxu3 %vm71_vm0, %v1677_v42  ;;  %v1392_v54 = vsel %vm551_vm6, 1.0, %v1501_v11 }
  0x2e   :  { %1360 = vmatpush.msk.msrb.mxu1 %vm47_vm7, %v1503_v21  ;;  %426 = vmatpush.msra.mxu0 %v1698_v49  ;;  %v1962_v49 = vsub.f32 %v1394_v4, %v1394_v4  ;;  %vm817_vm7 = vcmask 1041408   ;;  %v2005_v58 = vsub.f32 %v1392_v54, %v1392_v54 }
  0x2f   :  { %498 = vmatpush.msra.mxu2 %v379_v63  ;;  %1384 = vmatpush.msk.msra.mxu3 %vm305_vm10, %v1503_v21  ;;  %v819_v57 = vsel %vm817_vm7, %v1970_v50, 0 }
  0x30   :  { %1361 = vmatpush.msk.msrb.mxu1 %vm46_vm4, %v1503_v21  ;;  %vm552_vm4 = vcmp.eq.s32.totalorder %v1550_v7, %v1833_v51  ;;  %429 = vmatpush.msra.mxu0 %v1726_v56  ;;  %v628_v56 = vand.u32 4294901760, %v1962_v49  ;;  %v2027_v63 = vsub.f32 %v819_v57, %v819_v57  ;;  %v640_v23 = vand.u32 4294901760, %v2005_v58 }
  0x31   :  { %159 = vmatmul.f32.vlgmr.msra.gmra.mxu1 %v1789_v40  ;;  %502 = vmatpush.msra.mxu2 %v385_v31  ;;  %v1393_v48 = vsel %vm552_vm4, 1.0, %v1501_v11  ;;  %v2149_v57 = vadd.s32 1, %v1909_v29 }
  0x32   :  { %1376 = vmatpush.msk.msra.mxu1 %vm71_vm0, %v1677_v42  ;;  %1385 = vmatpush.msk.msra.mxu3 %vm304_vm11, %v1503_v21  ;;  %v1940_v42 = vsub.f32 %v1395_v37, %v1395_v37  ;;  %v1977_v52 = vsub.f32 %v1393_v48, %v1393_v48  ;;  %v629_v0 = vsub.f32 %v1962_v49, %v628_v56  ;;  %v864_v33 = vand.u32 4294901760, %v2027_v63 }
  0x33   :  { %506 = vmatpush.msra.mxu2 %v391_v32  ;;  %432 = vmatpush.msra.mxu0 %v1761_v13  ;;  %v1421_v13 = vsel %vm801_vm9, 1.0, %v1501_v11  ;;  %vm1023_vm1 = vcmp.eq.s32.totalorder %v1550_v7, %v2149_v57  ;;  %vm1022_vm5 = vcmp.eq.s32.totalorder %v1553_v8, %v2149_v57  ;;  %v1504_v7 = vmov 2  }
  0x34   :  { %1377 = vmatpush.msk.msra.mxu1 %vm305_vm10, %v1503_v21  ;;  %1386 = vmatpush.msk.msra.mxu3 %vm303_vm12, %v1503_v21  ;;  %v622_v53 = vand.u32 4294901760, %v1940_v42  ;;  %v634_v61 = vand.u32 4294901760, %v1977_v52  ;;  %vm549_vm10 = vcmp.eq.s32.totalorder %v1533_v1, %v1833_v51  ;;  %v2071_v31 = vsub.f32 %v1421_v13, %v1421_v13 }
  0x35   :  { %510 = vmatpush.msra.mxu2 %v397_v39  ;;  %435 = vmatpush.msra.mxu0 %v1763_v14  ;;  %v32_v14 = vld [vmem:[#allocation2] sm:$0xff]  ;;  %v1390_v18 = vsel %vm549_vm10, 1.0, %v1501_v11  ;;  %v630_v35 = vand.u32 4294901760, %v629_v0  ;;  %v641_v39 = vsub.f32 %v2005_v58, %v640_v23  ;;  %v865_v22 = vsub.f32 %v2027_v63, %v864_v33 }
  0x36   :  { %1378 = vmatpush.msk.msra.mxu1 %vm304_vm11, %v1503_v21  ;;  %1387 = vmatpush.msk.msra.mxu3 %vm302_vm13, %v1503_v21  ;;  %v623_v59 = vsub.f32 %v1940_v42, %v622_v53  ;;  %vm800_vm11 = vcmp.eq.s32.totalorder %v1553_v8, %v1909_v29  ;;  %v2080_v38 = vsub.f32 %v1390_v18, %v1390_v18  ;;  %v870_v46 = vand.u32 4294901760, %v2071_v31 }
  0x37   :  { %352 = vmatmul.f32.vlgmr.msrb.gmra.mxu2 %v1870_v27  ;;  %408 = vmatmul.f32.vlgmr.msrb.gmra.mxu3 %v1789_v40  ;;  %v1420_v32 = vsel %vm800_vm11, 1.0, %v1501_v11  ;;  %v642_v20 = vand.u32 4294901760, %v641_v39  ;;  %v866_v48 = vand.u32 4294901760, %v865_v22  ;;  %v1440_v5 = vsel %vm1022_vm5, 1.0, %v1501_v11 }
  0x38   :  { %1379 = vmatpush.msk.msra.mxu1 %vm303_vm12, %v1503_v21  ;;  %514 = vmatpush.msra.mxu2 %v403_v16  ;;  %vm813_vm12 = vcmask 277504   ;;  %v624_v25 = vand.u32 4294901760, %v623_v59  ;;  %v2101_v41 = vsub.f32 %v1420_v32, %v1420_v32  ;;  %v652_v17 = vand.u32 4294901760, %v2080_v38 }
  0x39   :  { %1388 = vmatpush.msk.msra.mxu3 %vm301_vm14, %v1503_v21  ;;  %438 = vmatpush.msra.mxu0 %v1775_v30  ;;  %v635_v30 = vsub.f32 %v1977_v52, %v634_v61  ;;  %v815_v34 = vsel %vm813_vm12, %v32_v14, 0  ;;  %v871_v54 = vsub.f32 %v2071_v31, %v870_v46  ;;  %vm1313_vm12 = vcmp.eq.s32.totalorder %v1535_v2, 0 }
  0x3a   :  { %672 = vmatpush.msrb.mxu2 %v1913_v36  ;;  %1380 = vmatpush.msk.msra.mxu1 %vm302_vm13, %v1503_v21  ;;  %vm799_vm13 = vcmp.eq.s32.totalorder %v1556_v9, %v1909_v29  ;;  %v2103_v43 = vand.u32 4294901760, %v815_v34  ;;  %v876_v37 = vand.u32 4294901760, %v2101_v41  ;;  %v653_v59 = vsub.f32 %v2080_v38, %v652_v17 }
  0x3b   :  { %1389 = vmatpush.msk.msra.mxu3 %vm300_vm15, %v1503_v21  ;;  %441 = vmatpush.msra.mxu0 %v1791_v19  ;;  %v646_v19 = vand.u32 4294901760, %v2046_v15  ;;  %v1419_v26 = vsel %vm799_vm13, 1.0, %v1501_v11  ;;  %v636_v16 = vand.u32 4294901760, %v635_v30  ;;  %v872_v14 = vand.u32 4294901760, %v871_v54 }
  0x3c   :  { %675 = vmatpush.msrb.mxu2 %v1940_v42  ;;  %1381 = vmatpush.msk.msra.mxu1 %vm301_vm14, %v1503_v21  ;;  %vm798_vm14 = vcmp.eq.s32.totalorder %v1533_v1, %v1909_v29  ;;  %v2120_v24 = vsub.f32 %v1419_v26, %v1419_v26  ;;  %v2140_v4 = vsub.f32 %v815_v34, %v2103_v43 }
  0x3d   :  { %1404 = vmatpush.msk.msrb.mxu3 %vm71_vm0, %v1877_v3  ;;  %267 = vmatmul.f32.vlgmr.msrb.gmra.mxu0 %v1789_v40  ;;  %v1418_v12 = vsel %vm798_vm14, 1.0, %v1501_v11  ;;  %v647_v28 = vsub.f32 %v2046_v15, %v646_v19  ;;  %v877_v0 = vsub.f32 %v2101_v41, %v876_v37 }
  0x3e   :  { %1397 = vmatpush.msk.msrb.mxu0 %vm71_vm0, %v1877_v3  ;;  %678 = vmatpush.msrb.mxu2 %v1962_v49  ;;  %v2146_v55 = vsub.f32 %v1418_v12, %v1418_v12  ;;  %v882_v60 = vand.u32 4294901760, %v2120_v24  ;;  %v2174_v13 = vand.u32 4294901760, %v2140_v4  ;;  %v1441_v49 = vsel %vm1023_vm1, 1.0, %v1501_v11 }
  0x3f   :  { %1405 = vmatpush.msk.msrb.mxu3 %vm554_vm2, %v1503_v21  ;;  %1382 = vmatpush.msk.msra.mxu1 %vm300_vm15, %v1503_v21  ;;  %vm1024_vm15 = vcmp.eq.s32.totalorder %v1547_v6, %v2149_v57 }
  0x40   :  { %295 = vmatmul.f32.vlgmr.msrb.gmra.mxu1 %v1789_v40  ;;  %1398 = vmatpush.msk.msrb.mxu0 %vm554_vm2, %v1503_v21  ;;  %v888_v18 = vand.u32 4294901760, %v2146_v55  ;;  %v883_v30 = vsub.f32 %v2120_v24, %v882_v60  ;;  %v845_v32 = vsub.f32 %v2140_v4, %v2174_v13  ;;  %v2198_v34 = vsel %vm1024_vm15, 1.0, %v1501_v11 }
  0x41   :  { %619 = vmatpush.msrb.mxu1 %v618_v62  ;;  %681 = vmatpush.msrb.mxu2 %v1977_v52  ;;  %v648_v62 = vand.u32 4294901760, %v647_v28 }
  0x42   :  { %1406 = vmatpush.msk.msrb.mxu3 %vm553_vm3, %v1503_v21  ;;  %516 = vmatmul.f32.vlgmr.msra.gmra.mxu2 %v1789_v40  ;;  %v884_v36 = vand.u32 4294901760, %v883_v30  ;;  %v2221_v42 = vand.u32 4294901760, %v845_v32 }
  0x43   :  { %1399 = vmatpush.msk.msrb.mxu0 %vm553_vm3, %v1503_v21  ;;  %625 = vmatpush.msrb.mxu1 %v624_v25  ;;  %v654_v25 = vand.u32 4294901760, %v653_v59 }
  0x44   :  { %684 = vmatpush.msrb.mxu2 %v2005_v58  ;;  %1407 = vmatpush.msk.msrb.mxu3 %vm552_vm4, %v1503_v21 }
  0x45   :  { %544 = vmatmul.f32.vlgmr.msra.gmra.mxu3 %v1789_v40  ;;  %1400 = vmatpush.msk.msrb.mxu0 %vm552_vm4, %v1503_v21 }
  0x46   :  { %631 = vmatpush.msrb.mxu1 %v630_v35  ;;  %687 = vmatpush.msrb.mxu2 %v2046_v15 }
  0x47   :  { %1408 = vmatpush.msk.msrb.mxu3 %vm551_vm6, %v1503_v21  ;;  %1401 = vmatpush.msk.msrb.mxu0 %vm551_vm6, %v1503_v21 }
  0x48   :  { %637 = vmatpush.msrb.mxu1 %v636_v16  ;;  %690 = vmatpush.msrb.mxu2 %v2080_v38 }
  0x49   :  { %1409 = vmatpush.msk.msrb.mxu3 %vm550_vm8, %v1503_v21  ;;  %444 = vmatmul.f32.vlgmr.msra.gmra.mxu0 %v1809_v44 }
  0x4a   :  { %1423 = vmatpush.msk.msra.mxu2 %vm817_vm7, %v1970_v50  ;;  %643 = vmatpush.msrb.mxu1 %v642_v20 }
  0x4b   :  { %1402 = vmatpush.msk.msrb.mxu0 %vm550_vm8, %v1503_v21  ;;  %1410 = vmatpush.msk.msrb.mxu3 %vm549_vm10, %v1503_v21 }
  0x4c   :  { %693 = vmatmul.f32.vlgmr.msrb.gmra.mxu2 %v1809_v44  ;;  %474 = vmatmul.f32.vlgmr.msra.gmra.mxu1 %v1819_v47  ;;  %v878_v44 = vand.u32 4294901760, %v877_v0 }
  0x4d   :  { %867 = vmatpush.msra.mxu3 %v866_v48  ;;  %1424 = vmatpush.msk.msra.mxu2 %vm801_vm9, %v1503_v21 }
  0x4e   :  { %1403 = vmatpush.msk.msrb.mxu0 %vm549_vm10, %v1503_v21  ;;  %649 = vmatpush.msrb.mxu1 %v648_v62 }
  0x4f   :  { %723 = vmatmul.f32.vlgmr.msrb.gmra.mxu3 %v1819_v47  ;;  %1425 = vmatpush.msk.msra.mxu2 %vm800_vm11, %v1503_v21  ;;  %v889_v47 = vsub.f32 %v2146_v55, %v888_v18 }
  0x50   :  { %739 = vmatpush.msra.mxu0 %v616_v45  ;;  %873 = vmatpush.msra.mxu3 %v872_v14  ;;  %v1036_v45 = vsel %vm817_vm7, %v2198_v34, 0 }
  0x51   :  { %655 = vmatpush.msrb.mxu1 %v654_v25  ;;  %1426 = vmatpush.msk.msra.mxu2 %vm799_vm13, %v1503_v21 }
  0x52   :  { %743 = vmatpush.msra.mxu0 %v622_v53  ;;  %879 = vmatpush.msra.mxu3 %v878_v44  ;;  %v2238_v53 = vsub.f32 %v1036_v45, %v1036_v45 }
  0x53   :  { %1411 = vmatpush.msk.msra.mxu1 %vm71_vm0, %v1877_v3  ;;  %1427 = vmatpush.msk.msra.mxu2 %vm798_vm14, %v1503_v21  ;;  %v890_v3 = vand.u32 4294901760, %v889_v47  ;;  %vm1021_vm0 = vcmp.eq.s32.totalorder %v1556_v9, %v2149_v57 }
  0x54   :  { %747 = vmatpush.msra.mxu0 %v628_v56  ;;  %885 = vmatpush.msra.mxu3 %v884_v36  ;;  %v1439_v52 = vsel %vm1021_vm0, 1.0, %v1501_v11  ;;  %v1081_v6 = vand.u32 4294901760, %v2238_v53  ;;  %v2267_v56 = vsub.f32 %v1440_v5, %v1440_v5 }
  0x55   :  { %1412 = vmatpush.msk.msra.mxu1 %vm554_vm2, %v1503_v21  ;;  %601 = vmatmul.f32.vlgmr.msrb.gmra.mxu0 %v1870_v27  ;;  %v2254_v27 = vsub.f32 %v1441_v49, %v1441_v49  ;;  %vm1020_vm2 = vcmp.eq.s32.totalorder %v1533_v1, %v2149_v57  ;;  %v2278_v35 = vsub.f32 %v1439_v52, %v1439_v52 }
  0x56   :  { %910 = vmatpush.msrb.mxu2 %v2027_v63  ;;  %751 = vmatpush.msra.mxu0 %v634_v61  ;;  %v1438_v39 = vsel %vm1020_vm2, 1.0, %v1501_v11  ;;  %v1082_v58 = vsub.f32 %v2238_v53, %v1081_v6 }
  0x57   :  { %1413 = vmatpush.msk.msra.mxu1 %vm553_vm3, %v1503_v21  ;;  %847 = vmatmul.f32.vlgmr.msra.gmra.mxu2 %v2221_v42  ;;  %v1087_v61 = vand.u32 4294901760, %v2254_v27  ;;  %v1104_v15 = vsub.f32 %v1438_v39, %v1438_v39  ;;  %v1099_v26 = vand.u32 4294901760, %v2278_v35  ;;  %vm1256_vm3 = vcmask 138240   ;;  %v1465_v39 = vld [vmem:[%s2453_s0] ss:$0 sm:$0xff] }
  0x58   :  { %891 = vmatpush.msra.mxu3 %v890_v3  ;;  %657 = vmatmul.f32.vlgmr.msrb.gmra.mxu1 %v1789_v40  ;;  %v1083_v38 = vand.u32 4294901760, %v1082_v58 }
  0x59   :  { %913 = vmatpush.msrb.mxu2 %v2071_v31  ;;  %755 = vmatpush.msra.mxu0 %v640_v23  ;;  %v1093_v23 = vand.u32 4294901760, %v2267_v56  ;;  %v1105_v22 = vand.u32 4294901760, %v1104_v15 }
  0x5a   :  { %1428 = vmatpush.msk.msrb.mxu3 %vm817_vm7, %v1970_v50  ;;  %1414 = vmatpush.msk.msra.mxu1 %vm552_vm4, %v1503_v21 }
  0x5b   :  { %893 = vmatmul.f32.vlgmr.msra.gmra.mxu3 %v2103_v43  ;;  %916 = vmatpush.msrb.mxu2 %v2101_v41  ;;  %v1094_v16 = vsub.f32 %v2267_v56, %v1093_v23  ;;  %v1106_v63 = vsub.f32 %v1104_v15, %v1105_v22 }
  0x5c   :  { %1429 = vmatpush.msk.msrb.mxu3 %vm801_vm9, %v1503_v21  ;;  %759 = vmatpush.msra.mxu0 %v646_v19  ;;  %v1088_v19 = vsub.f32 %v2254_v27, %v1087_v61 }
  0x5d   :  { %1415 = vmatpush.msk.msra.mxu1 %vm551_vm6, %v1503_v21  ;;  %919 = vmatpush.msrb.mxu2 %v2120_v24 }
  0x5e   :  { %1430 = vmatpush.msk.msrb.mxu3 %vm800_vm11, %v1503_v21  ;;  %763 = vmatpush.msra.mxu0 %v652_v17  ;;  %v1089_v51 = vand.u32 4294901760, %v1088_v19  ;;  %v1100_v17 = vsub.f32 %v2278_v35, %v1099_v26 }
  0x5f   :  { %1416 = vmatpush.msk.msra.mxu1 %vm550_vm8, %v1503_v21  ;;  %765 = vmatmul.f32.vlgmr.msra.gmra.mxu0 %v1789_v40 }
  0x60   :  { %922 = vmatpush.msrb.mxu2 %v2146_v55  ;;  %1431 = vmatpush.msk.msrb.mxu3 %vm799_vm13, %v1503_v21 }
  0x61   :  { %1417 = vmatpush.msk.msra.mxu1 %vm549_vm10, %v1503_v21  ;;  %925 = vmatmul.f32.vlgmr.msrb.gmra.mxu2 %v2140_v4 }
  0x62   :  { %1443 = vmatpush.msk.msra.mxu2 %vm817_vm7, %v2198_v34  ;;  %793 = vmatmul.f32.vlgmr.msra.gmra.mxu1 %v1789_v40  ;;  %v1095_v40 = vand.u32 4294901760, %v1094_v16 }
  0x63   :  { %1432 = vmatpush.msk.msrb.mxu3 %vm798_vm14, %v1503_v21  ;;  %971 = vmatpush.msrb.mxu0 %v864_v33  ;;  %v1101_v33 = vand.u32 4294901760, %v1100_v17 }
  0x64   :  { %953 = vmatmul.f32.vlgmr.msrb.gmra.mxu3 %v2174_v13  ;;  %1444 = vmatpush.msk.msra.mxu2 %vm1023_vm1, %v1503_v21 }
  0x65   :  { %1084 = vmatpush.msra.mxu3 %v1083_v38  ;;  %975 = vmatpush.msrb.mxu0 %v870_v46 }
  0x66   :  { %1433 = vmatpush.msk.msrb.mxu1 %vm817_vm7, %v1970_v50  ;;  %1445 = vmatpush.msk.msra.mxu2 %vm1022_vm5, %v1503_v21  ;;  %v1107_v50 = vand.u32 4294901760, %v1106_v63 }
  0x67   :  { %1090 = vmatpush.msra.mxu3 %v1089_v51  ;;  %979 = vmatpush.msrb.mxu0 %v876_v37 }
  0x68   :  { %1434 = vmatpush.msk.msrb.mxu1 %vm801_vm9, %v1503_v21  ;;  %1446 = vmatpush.msk.msra.mxu2 %vm1021_vm0, %v1503_v21 }
  0x69   :  { %1096 = vmatpush.msra.mxu3 %v1095_v40  ;;  %983 = vmatpush.msrb.mxu0 %v882_v60 }
  0x6a   :  { %1435 = vmatpush.msk.msrb.mxu1 %vm800_vm11, %v1503_v21  ;;  %1447 = vmatpush.msk.msra.mxu2 %vm1020_vm2, %v1503_v21  ;;  %vm1317_vm11 = vcmp.eq.s32.totalorder %v1535_v2, 1 }
  0x6b   :  { %1102 = vmatpush.msra.mxu3 %v1101_v33  ;;  %987 = vmatpush.msrb.mxu0 %v888_v18 }
  0x6c   :  { %1436 = vmatpush.msk.msrb.mxu1 %vm799_vm13, %v1503_v21  ;;  %1188 = vmatpush.msrb.mxu2 %v1081_v6  ;;  %vm1322_vm13 = vcmp.eq.s32.totalorder %v1535_v2, 2 }
  0x6d   :  { %989 = vmatmul.f32.vlgmr.msrb.gmra.mxu0 %v2103_v43  ;;  %1064 = vmatmul.f32.vlgmr.msra.gmra.mxu2 %v2221_v42 }
  0x6e   :  { %1108 = vmatpush.msra.mxu3 %v1107_v50  ;;  %1437 = vmatpush.msk.msrb.mxu1 %vm798_vm14, %v1503_v21  ;;  %vm1327_vm14 = vcmask 23552  }
  0x6f   :  { %1127 = vmatpush.msra.mxu0 %v2238_v53  ;;  %1192 = vmatpush.msrb.mxu2 %v1087_v61 }
  0x70   :  { %1453 = vmatpush.msk.msrb.mxu3 %vm817_vm7, %v2198_v34  ;;  %1015 = vmatmul.f32.vlgmr.msrb.gmra.mxu1 %v2103_v43 }
  0x71   :  { %1110 = vmatmul.f32.vlgmr.msra.gmra.mxu3 %v2103_v43  ;;  %1130 = vmatpush.msra.mxu0 %v2254_v27 }
  0x72   :  { %1448 = vmatpush.msk.msra.mxu1 %vm817_vm7, %v2198_v34  ;;  %1196 = vmatpush.msrb.mxu2 %v1093_v23 }
  0x73   :  { %1454 = vmatpush.msk.msrb.mxu3 %vm1023_vm1, %v1503_v21  ;;  %1133 = vmatpush.msra.mxu0 %v2267_v56 }
  0x74   :  { %1449 = vmatpush.msk.msra.mxu1 %vm1023_vm1, %v1503_v21  ;;  %1200 = vmatpush.msrb.mxu2 %v1099_v26 }
  0x75   :  { %1455 = vmatpush.msk.msrb.mxu3 %vm1022_vm5, %v1503_v21  ;;  %1136 = vmatpush.msra.mxu0 %v2278_v35 }
  0x76   :  { %1450 = vmatpush.msk.msra.mxu1 %vm1022_vm5, %v1503_v21  ;;  %1204 = vmatpush.msrb.mxu2 %v1105_v22 }
  0x77   :  { %1456 = vmatpush.msk.msrb.mxu3 %vm1021_vm0, %v1503_v21  ;;  %1206 = vmatmul.f32.vlgmr.msrb.gmra.mxu2 %v2103_v43  ;;  %v1267_v8 = vpop.permute.xlu0 %1266 }
  0x78   :  { %1139 = vmatpush.msra.mxu0 %v1104_v15  ;;  %1451 = vmatpush.msk.msra.mxu1 %vm1021_vm0, %v1503_v21  ;;  %v1269_v9 = vmul.f32 %v1267_v8, %v1569_v10 }
  0x79   :  { %1457 = vmatpush.msk.msrb.mxu3 %vm1020_vm2, %v1503_v21  ;;  %1142 = vmatmul.f32.vlgmr.msra.gmra.mxu0 %v2140_v4 }
  0x7a   :  { %1232 = vmatmul.f32.vlgmr.msrb.gmra.mxu3 %v2103_v43  ;;  %1452 = vmatpush.msk.msra.mxu1 %vm1020_vm2, %v1503_v21 }
  0x7b   :  { %1170 = vmatmul.f32.vlgmr.msra.gmra.mxu1 %v2174_v13  ;;  %1464 = vset.pattern.permute.xlu0 %v1504_v7 }
  0x7c   :  { %1273 = vperm.xlu0 %1464, %v1269_v9  }
  0xa7   :  { %v196_v29 = vpop.f32.mrf.mxu2  ;;  %v104_v31 = vpop.f32.mrf.mxu0 }
  0xae   :  { %v160_v46 = vpop.f32.mrf.mxu1 }
  0xaf   :  { %v226_v41 = vpop.f32.mrf.mxu3  ;;  %v161_v49 = vadd.f32 %v160_v46, %v104_v31 }
  0xb1   :  { %v197_v61 = vadd.f32 %v196_v29, %v161_v49 }
  0xb3   :  { %v227_v16 = vadd.f32 %v226_v41, %v197_v61 }
  0xba   :  { %v353_v24 = vpop.f32.mrf.mxu2  ;;  %v2423_v12 = vpop.f32.mrf.mxu0 }
  0xbb   :  { %v409_v43 = vpop.f32.mrf.mxu3  ;;  %v269_v29 = vadd.f32 %v2423_v12, %v227_v16 }
  0xbc   :  { %v410_v27 = vadd.f32 %v409_v43, %v353_v24 }
  0xbd   :  { %v2425_v20 = vpop.f32.mrf.mxu1 }
  0xc5   :  { %v2427_v1 = vpop.f32.mrf.mxu2 }
  0xc6   :  { %v445_v21 = vpop.f32.mrf.mxu0 }
  0xc7   :  { %v446_v23 = vadd.f32 %v445_v21, %v410_v27 }
  0xc8   :  { %v2429_v28 = vpop.f32.mrf.mxu3 }
  0xc9   :  { %v475_v37 = vpop.f32.mrf.mxu1 }
  0xca   :  { %v476_v33 = vadd.f32 %v475_v37, %v446_v23  ;;  %v297_v37 = vadd.f32 %v2425_v20, %v269_v29 }
  0xcc   :  { %v518_v43 = vadd.f32 %v2427_v1, %v476_v33 }
  0xce   :  { %v546_v12 = vadd.f32 %v2429_v28, %v518_v43 }
  0xcf   :  { %v694_v4 = vpop.f32.mrf.mxu2 }
  0xd2   :  { %v602_v48 = vpop.f32.mrf.mxu0  ;;  %v724_v10 = vpop.f32.mrf.mxu3 }
  0xd5   :  { %v658_v54 = vpop.f32.mrf.mxu1 }
  0xd6   :  { %v659_v55 = vadd.f32 %v658_v54, %v602_v48 }
  0xd8   :  { %v695_v57 = vadd.f32 %v694_v4, %v659_v55 }
  0xda   :  { %v848_v59 = vpop.f32.mrf.mxu2  ;;  %v725_v60 = vadd.f32 %v724_v10, %v695_v57 }
  0xdc   :  { %v766_v62 = vpop.f32.mrf.mxu0 }
  0xdd   :  { %v767_v0 = vadd.f32 %v766_v62, %v725_v60 }
  0xde   :  { %v894_v13 = vpop.f32.mrf.mxu3 }
  0xdf   :  { %v794_v14 = vpop.f32.mrf.mxu1  ;;  %v895_v25 = vadd.f32 %v894_v13, %v848_v59 }
  0xe0   :  { %v795_v18 = vadd.f32 %v794_v14, %v767_v0 }
  0xe2   :  { %v1242_v30 = vand.u32 2147483647, %v795_v18  ;;  %v1239_v17 = vmax.f32 %v795_v18, 0.0 }
  0xe4   :  { %v1243_v44 = vsub.f32 0.0, %v1242_v30  ;;  %v926_v32 = vpop.f32.mrf.mxu2 }
  0xe5   :  { %v927_v34 = vadd.f32 %v926_v32, %v895_v25 }
  0xe6   :  { %v1244_v47 = vmul.f32 1.442695, %v1243_v44 }
  0xe7   :  { %v954_v36 = vpop.f32.mrf.mxu3 }
  0xe8   :  { %1466 = vpow2.f32 %v1244_v47  ;;  %v955_v45 = vadd.f32 %v954_v36, %v927_v34 }
  0xea   :  { %v990_v42 = vpop.f32.mrf.mxu0 }
  0xeb   :  { %v991_v3 = vadd.f32 %v990_v42, %v955_v45 }
  0xed   :  { %v1016_v53 = vpop.f32.mrf.mxu1 }
  0xee   :  { %v1467_v5 = vpop.eup %1466  ;;  %v1017_v52 = vadd.f32 %v1016_v53, %v991_v3  ;;  %v1274_v38 = vpop.permute.xlu0 %1273 }
  0xef   :  { %v1246_v6 = vadd.f32 1.0, %v1467_v5  ;;  %v1249_v56 = vmul.f32 -0.5, %v1467_v5  ;;  %v1252_v26 = vand.u32 2147483647, %v1467_v5  ;;  %v1279_v51 = vmul.f32 %v1465_v39, %v1274_v38 }
  0xf0   :  { %vm1236_vm4 = vcmp.ne.f32.partialorder %v1017_v52, 0.0  ;;  %v1065_v35 = vpop.f32.mrf.mxu2  ;;  %v1260_v59 = vsub.f32 %v297_v37, %v1017_v52 }
  0xf1   :  { %v2435_v58 = vsel %vm1236_vm4, 1.0, %v1501_v11  ;;  %1468 = vlog2.f32 %v1246_v6  ;;  %v1250_v19 = vadd.f32 1.0, %v1249_v56  ;;  %v1280_v7 = vadd.f32 1e-09, %v1279_v51 }
  0xf2   :  { %v1303_v15 = vsel %vm1256_vm3, %v2435_v58, 0.0  ;;  %v1240_v63 = vmul.f32 %v2435_v58, %v795_v18  ;;  %vm1253_vm6 = vcmp.lt.f32.partialorder %v1252_v26, 0.0004427343  ;;  %v1261_v14 = vmul.f32 %v1260_v59, %v1260_v59 }
  0xf3   :  { %1304 = vadd.xlane.f32.xlu2 %v1303_v15  ;;  %v1251_v11 = vmul.f32 %v1467_v5, %v1250_v19  ;;  %1470 = vrcp.f32 %v1280_v7  ;;  %v1292_v18 = vand.u32 2147483648, %v1280_v7  ;;  %v1290_v30 = vand.u32 2147483647, %v1280_v7 }
  0xf4   :  { %v1111_v22 = vpop.f32.mrf.mxu3  ;;  %v1241_v41 = vsub.f32 %v1239_v17, %v1240_v63  ;;  %vm1286_vm8 = vweird.f32 %v1280_v7 }
  0xf5   :  { %v1112_v40 = vadd.f32 %v1111_v22, %v1065_v35  ;;  %v1293_v32 = vor.u32 1.1754944e-38, %v1292_v18  ;;  %vm1291_vm10 = vcmp.eq.f32.partialorder %v1290_v30, 8.507059e+37 }
  0xf6   :  { %v1143_v50 = vpop.f32.mrf.mxu0 }
  0xf7   :  { %v1469_v8 = vpop.eup %1468  ;;  %v1144_v9 = vadd.f32 %v1143_v50, %v1112_v40 }
  0xf8   :  { %v1171_v31 = vpop.f32.mrf.mxu1  ;;  %v1248_v46 = vmul.f32 0.6931472, %v1469_v8 }
  0xf9   :  { %v1172_v24 = vadd.f32 %v1171_v31, %v1144_v9  ;;  %v1471_v57 = vpop.eup %1470 }
  0xfa   :  { %v1207_v21 = vpop.f32.mrf.mxu2  ;;  %v1254_v4 = vsel %vm1253_vm6, %v1251_v11, %v1248_v46  ;;  %v1282_v62 = vmul.f32 %v1471_v57, %v1280_v7  ;;  %vm1287_vm7 = vweird.f32 %v1471_v57 }
  0xfb   :  { %v1208_v48 = vadd.f32 %v1207_v21, %v1172_v24  ;;  %v1255_v10 = vadd.f32 %v1254_v4, %v1241_v41  ;;  %vm1288_vm9 = vmor %vm1286_vm8, %vm1287_vm7 }
  0xfc   :  { %v1283_v13 = vsub.f32 1.0, %v1282_v62 }
  0xfd   :  { %v1233_v54 = vpop.f32.mrf.mxu3  ;;  %v1257_v55 = vsel %vm1256_vm3, %v1255_v10, 0.0 }
  0xfe   :  { %v1234_v60 = vadd.f32 %v1233_v54, %v1208_v48  ;;  %1258 = vadd.xlane.f32.xlu1 %v1257_v55  ;;  %v1284_v25 = vmul.f32 %v1471_v57, %v1283_v13 }
 0x100   :  { %v1262_v0 = vsub.f32 %v546_v12, %v1234_v60  ;;  %v1285_v20 = vadd.f32 %v1471_v57, %v1284_v25 }
 0x102   :  { %v1263_v1 = vmul.f32 %v1262_v0, %v1262_v0  ;;  %v1289_v47 = vsel %vm1288_vm9, %v1471_v57, %v1285_v20 }
 0x103   :  { %v1294_v28 = vsel %vm1291_vm10, %v1293_v32, %v1289_v47 }
 0x104   :  { %v1264_v44 = vadd.f32 %v1263_v1, %v1261_v14 }
 0x106   :  { %v1270_v34 = vsub.f32 0.0, %v1264_v44 }
 0x108   :  { %v1295_v36 = vmul.f32 %v1294_v28, %v1270_v34 }
 0x10a   :  { %v1296_v45 = vmul.f32 1.442695, %v1295_v36 }
 0x10c   :  { %1472 = vpow2.f32 %v1296_v45 }
 0x112   :  { %v1473_v42 = vpop.eup %1472 }
 0x113   :  { %v1298_v3 = vsub.f32 1.0, %v1473_v42 }
 0x115   :  { %v1299_v49 = vmul.f32 %v2435_v58, %v1298_v3 }
 0x117   :  { %v1300_v53 = vsel %vm1256_vm3, %v1299_v49, 0.0 }
 0x118   :  { %1301 = vadd.xlane.f32.xlu1 %v1300_v53 }
 0x166   :  { %v1305_v27 = vpop.xlane.xlu2 %1304 }
 0x167   :  { %v1325_v35 = vsel %vm1322_vm13, %v1305_v27, 0.0 }
 0x171   :  { %v1259_v5 = vpop.xlane.xlu1 %1258 }
 0x172   :  { %v1320_v6 = vsel %vm1317_vm11, %v1259_v5, 0.0 }
 0x18b   :  { %v1302_v52 = vpop.xlane.xlu1 %1301 }
 0x18c   :  { %v1316_v56 = vsel %vm1313_vm12, %v1302_v52, 0.0 }
 0x18d   :  { %v1321_v61 = vadd.f32 %v1320_v6, %v1316_v56 }
 0x18f   :  { %v1326_v39 = vadd.f32 %v1325_v35, %v1321_v61 }
 0x191   :  { %1328 = vst.msk [vmem:[%s2457_s4] sm:$0xff] %vm1327_vm14, %v1326_v39 }
 0x192   :  { %1333 = vsyncpa [#allocation3], 1 }

</bundles_post_ra>
